<compile_context>
chip_gen: v5e
topology: v5e:2x2
jax: 0.10.0
libtpu: 0.0.40
codegen_flags: <defaults>
</compile_context>

<pallas_src>
import functools

import jax
import jax.numpy as jnp
from jax.experimental import pallas as pl
from jax.experimental.pallas import tpu as pltpu


def _round_up(x, m):
    return (x + m - 1) // m * m


# --------------------------------------------------------------------------
# Kernel 1: per-node messages  m = X_scaled @ W   (bf16 in, f32 acc, bf16 out)
# (X_scaled already carries the degree^-0.5 source normalization.)
# --------------------------------------------------------------------------
def message_kernel(x_ref, w_ref, m_ref):
    m_ref[...] = jnp.dot(
        x_ref[...], w_ref[...], preferred_element_type=jnp.float32
    ).astype(m_ref.dtype)


# --------------------------------------------------------------------------
# Kernel 2: aggregation  out = relu( A @ m ), grid = (dst tiles, src tiles),
# reduction (src) axis last, accumulate directly into the VMEM-resident f32
# output block (index_map ignores k).
# --------------------------------------------------------------------------
def aggregate_kernel_resident(adj_ref, m_ref, out_ref, *, tile):
    """m is fully VMEM-resident; slice the src tile in-kernel."""
    k = pl.program_id(1)

    @pl.when(k == 0)
    def _():
        out_ref[...] = jnp.zeros_like(out_ref)

    adj = adj_ref[...].astype(jnp.bfloat16)          # int8 -> bf16 in VMEM
    src0 = pl.multiple_of(k * tile, tile)
    out_ref[...] += jnp.dot(adj, m_ref[pl.ds(src0, tile), :],
                            preferred_element_type=jnp.float32)

    @pl.when(k == pl.num_programs(1) - 1)
    def _():
        out_ref[...] = jnp.maximum(out_ref[...], 0.0)


def aggregate_kernel_streamed(adj_ref, m_ref, out_ref):
    """Fallback: m streamed per src tile (when it does not fit VMEM)."""
    k = pl.program_id(1)

    @pl.when(k == 0)
    def _():
        out_ref[...] = jnp.zeros_like(out_ref)

    out_ref[...] += jnp.dot(adj_ref[...].astype(jnp.bfloat16), m_ref[...],
                            preferred_element_type=jnp.float32)

    @pl.when(k == pl.num_programs(1) - 1)
    def _():
        out_ref[...] = jnp.maximum(out_ref[...], 0.0)


# --------------------------------------------------------------------------
# Wrapper
# --------------------------------------------------------------------------
def gcn_layer(feature, weight, adj, degree, *, tile=2048):
    """feature: (N, in_dim), weight: (in_dim, out_dim),
       adj: (N, N) with adj[dst, src] = 1 (int8 preferred; 0/1 unweighted),
       degree: (N, 1) out-degree of each source node."""
    n, in_dim = feature.shape
    out_dim = weight.shape[1]

    f32, bf16 = jnp.float32, jnp.bfloat16

    # Lane-dense / MXU-aligned padded output width.
    out_p = _round_up(out_dim, 128)

    # ---- tile selection -----------------------------------------------------
    n128 = _round_up(n, 128)
    t = min(tile, n128)
    # Wide out_dim -> shrink the tile so the f32 output tiles stay bounded
    # (guard against flipping from HBM-bound to VMEM/spill-bound).
    t = min(t, _round_up(max(128, (2048 * 128) // out_p), 128))
    # Keep >= 2 dst tiles on large graphs so the "parallel" dst axis can shard
    # across the two TensorCores on v7x.
    if t == n128 and n128 >= 256:
        t = _round_up(n128 // 2, 128)
    n_p = _round_up(n, t)

    # ---- adjacency: int8 HBM stream, zero-copy when caller pre-stored it -----
    if adj.dtype == jnp.int8 and adj.shape == (n_p, n_p):
        adj_i8 = adj  # fast path: no extra N^2 HBM pass
    else:
        # One-time pad+cast pass over the N^2 array.  Callers that reuse the
        # graph across layers/iterations should pre-store (n_p, n_p) int8.
        # (int8 is exact only for an unweighted 0/1 adjacency.)
        adj_i8 = jnp.zeros((n_p, n_p), jnp.int8).at[:n, :n].set(
            adj.astype(jnp.int8))

    # ---- fold src-degree normalization into the one-time X cast --------------
    degree = degree.astype(f32).reshape(n, 1)
    norm = jnp.where(degree > 0.0, jax.lax.rsqrt(degree), 0.0)
    x_scaled = feature.astype(f32) * norm
    x_p = jnp.zeros((n_p, in_dim), bf16).at[:n, :].set(x_scaled.astype(bf16))
    w_p = jnp.zeros((in_dim, out_p), bf16).at[:, :out_dim].set(
        weight.astype(bf16))

    # ---- Kernel 1: messages (bf16 operands, f32 acc, bf16 out) ---------------
    m_bf16 = pl.pallas_call(
        message_kernel,
        out_shape=jax.ShapeDtypeStruct((n_p, out_p), bf16),
        grid_spec=pltpu.PrefetchScalarGridSpec(
            num_scalar_prefetch=0,
            grid=(n_p // t,),
            in_specs=[
                pl.BlockSpec((t, in_dim), lambda i: (i, 0)),
                pl.BlockSpec((in_dim, out_p), lambda i: (0, 0)),
            ],
            out_specs=pl.BlockSpec((t, out_p), lambda i: (i, 0)),
        ),
        compiler_params=pltpu.CompilerParams(
            dimension_semantics=("parallel",)),
    )(x_p, w_p)

    # ---- Kernel 2: aggregation ------------------------------------------------
    num_src_tiles = n_p // t

    # m resident in VMEM when small enough; otherwise re-tile per src step.
    m_bytes = n_p * out_p * 2
    m_resident = m_bytes <= (4 << 20)
    if m_resident:
        agg_kernel = functools.partial(aggregate_kernel_resident, tile=t)
        m_spec = pl.BlockSpec((n_p, out_p), lambda i, k: (0, 0))
        m_vmem = 2 * m_bytes
    else:
        agg_kernel = aggregate_kernel_streamed
        m_spec = pl.BlockSpec((t, out_p), lambda i, k: (k, 0))
        m_vmem = 2 * t * out_p * 2

    # Triple-buffer the adjacency stream only when there are enough src steps.
    if num_src_tiles >= 3:
        adj_spec = pl.BlockSpec((t, t), lambda i, k: (i, k),
                                pipeline_mode=pl.Buffered(3))
        adj_bufs = 3
    else:
        adj_spec = pl.BlockSpec((t, t), lambda i, k: (i, k))
        adj_bufs = 2

    # VMEM budget: int8 adj tiles + f32 output tiles + m + margin.
    vmem_bytes = adj_bufs * t * t + 2 * t * out_p * 4 + m_vmem + (4 << 20)
    vmem_limit = int(min(max(vmem_bytes, 16 << 20), 40 << 20))

    out_padded = pl.pallas_call(
        agg_kernel,
        out_shape=jax.ShapeDtypeStruct((n_p, out_p), f32),
        grid_spec=pltpu.PrefetchScalarGridSpec(
            num_scalar_prefetch=0,
            grid=(n_p // t, num_src_tiles),
            in_specs=[adj_spec, m_spec],
            out_specs=pl.BlockSpec((t, out_p), lambda i, k: (i, 0)),
        ),
        compiler_params=pltpu.CompilerParams(
            dimension_semantics=("parallel", "arbitrary"),
            vmem_limit_bytes=vmem_limit),
    )(adj_i8, m_bf16)

    return out_padded[:n, :out_dim]


if __name__ == "__main__":
    key = jax.random.PRNGKey(0)
    k_feat, k_w, k_adj = jax.random.split(key, 3)

    N, IN_DIM, OUT_DIM = 128, 16, 32

    feature = jax.random.normal(k_feat, (N, IN_DIM), dtype=jnp.float32)
    # torch.rand(in_dim, out_dim) -> uniform [0, 1)
    weight = jax.random.uniform(k_w, (IN_DIM, OUT_DIM), dtype=jnp.float32)

    # Random directed graph with self-loops (degree >= 1), adj[dst, src] = 1.
    adj_f32 = (jax.random.uniform(k_adj, (N, N)) < 0.1).astype(jnp.float32)
    adj_f32 = jnp.maximum(adj_f32, jnp.eye(N, dtype=jnp.float32))
    # Pre-stored kernel-layout adjacency (int8, N is already a multiple of the
    # tile) -> the wrapper streams it directly with zero extra HBM passes.
    adj_i8 = adj_f32.astype(jnp.int8)

    # g.ndata['degree']: out-degree of each (source) node, shape (N, 1).
    degree = jnp.sum(adj_f32, axis=0).reshape(N, 1).astype(jnp.float32)

    out = gcn_layer(feature, weight, adj_i8, degree)
    out = jax.block_until_ready(out)

    # pure-JAX f32 reference of the original module semantics
    norm = jnp.where(degree > 0, jax.lax.rsqrt(degree), 0.0)
    ref = jnp.maximum(adj_f32 @ ((feature @ weight) * norm), 0.0)
    # bf16 operand/message streaming -> relaxed tolerance vs f32 reference
    assert jnp.allclose(out, ref, atol=2e-2, rtol=2e-2), "mismatch vs reference"

    print("KERNEL_OK")
</pallas_src>

<mosaic_0001>
module attributes {stable_mosaic.version = 11 : i64} {
  func.func @message_kernel(%arg0: i32, %arg1: memref<128x16xbf16, #tpu.memory_space<vmem>>, %arg2: memref<16x128xbf16, #tpu.memory_space<vmem>>, %arg3: memref<128x128xbf16, #tpu.memory_space<vmem>>) attributes {dimension_semantics = [#tpu.dimension_semantics<parallel>], iteration_bounds = array<i64: 1>, scalar_prefetch = 0 : i64, scratch_operands = 0 : i64, tpu.core_type = #tpu.core_type<tc>, window_params = [{transform_indices = @transform_0, window_bounds = array<i64: 128, 16>}, {pipeline_mode = #tpu.pipeline_mode<synchronous>, transform_indices = @transform_1, window_bounds = array<i64: 16, 128>}, {transform_indices = @transform_2, window_bounds = array<i64: 128, 128>}]} {
    %c0 = arith.constant 0 : index
    %c0_0 = arith.constant 0 : index
    %0 = vector.load %arg1[%c0, %c0_0] : memref<128x16xbf16, #tpu.memory_space<vmem>>, vector<128x16xbf16>
    %c0_1 = arith.constant 0 : index
    %c0_2 = arith.constant 0 : index
    %1 = vector.load %arg2[%c0_1, %c0_2] : memref<16x128xbf16, #tpu.memory_space<vmem>>, vector<16x128xbf16>
    %cst = arith.constant dense<0.000000e+00> : vector<128x128xf32>
    %2 = tpu.matmul %0, %1, %cst {dimension_numbers = #tpu.dot_dimension_numbers<[1], [0], [0], [1], [0, 0, 1, 1], [], []>} : vector<128x16xbf16>, vector<16x128xbf16>, vector<128x128xf32> -> vector<128x128xf32>
    %3 = arith.truncf %2 : vector<128x128xf32> to vector<128x128xbf16>
    %c0_3 = arith.constant 0 : index
    %c0_4 = arith.constant 0 : index
    %4 = vector.load %arg3[%c0_3, %c0_4] : memref<128x128xbf16, #tpu.memory_space<vmem>>, vector<128x128xbf16>
    tpu.vector_store %arg3[%c0_3, %c0_4], %3 {strides = array<i32>} : memref<128x128xbf16, #tpu.memory_space<vmem>>, vector<128x128xbf16>,
    return
  }
  func.func @transform_0(%arg0: i32) -> (i32, i32) {
    %c0_i32 = arith.constant 0 : i32
    %c0_i32_0 = arith.constant 0 : i32
    return %arg0, %c0_i32 : i32, i32
  }
  func.func @transform_1(%arg0: i32) -> (i32, i32) {
    %c0_i32 = arith.constant 0 : i32
    %c0_i32_0 = arith.constant 0 : i32
    %c0_i32_1 = arith.constant 0 : i32
    return %c0_i32, %c0_i32_0 : i32, i32
  }
  func.func @transform_2(%arg0: i32) -> (i32, i32) {
    %c0_i32 = arith.constant 0 : i32
    %c0_i32_0 = arith.constant 0 : i32
    return %arg0, %c0_i32 : i32, i32
  }
}

</mosaic_0001>

<bundles_post_ra>
// kernel: tpu_custom_call.1
= control target key start
LH: loop header
LB: loop body
LE: loop exit
PB: predicated region body
PF: predicated region fallthrough
CT: control target
= control target key end

     0   :  { %vm77_vm0 = vcmask 130048   ;;  %s389_s0 = inlined_call_operand.vmem [shape: bf16[128,16], index: 0, kind: input, shape index: {}]   ;;  %s390_s1 = inlined_call_operand.vmem [shape: bf16[16,128], index: 1, kind: input, shape index: {}]   ;;  %s391_s2 = inlined_call_operand.hbm [shape: bf16[128,128], index: 2, kind: output, shape index: {}]  }
   0x1   :  { %v253_v0 = vld [vmem:[%s390_s1] sm:$0xff]  ;;  %v247_v2 = vld [vmem:[%s389_s0 + $0x10] sm:$0xff] }
   0x2   :  { %v245_v1 = vld [vmem:[%s389_s0] sm:$0xff]  ;;  %109 = vmatpush.bf16.msra.mxu0 %v253_v0  ;;  %301 = vmatpush.bf16.msra.mxu1 %v253_v0  ;;  %v251_v4 = vld [vmem:[%s389_s0 + $0x30] sm:$0xff] }
   0x3   :  { %v249_v3 = vld [vmem:[%s389_s0 + $0x20] sm:$0xff]  ;;  %302 = vmatpush.bf16.msra.mxu2 %v253_v0  ;;  %303 = vmatpush.bf16.msra.mxu3 %v253_v0 }
   0x4   :  { %7 = vsyncpa [#allocation3], 0  ;;  %v246_v5 = vld [vmem:[%s389_s0 + $0x8] sm:$0xff]  ;;  %v248_v6 = vld [vmem:[%s389_s0 + $0x18] sm:$0xff]  ;;  %s189_s29 = sshll.u32 %s391_s2, 4  ;;  %s334_s30 = smov 64   ;;  %s190_s29 = int_to_ptr.hbm [resolvable:$true] %s189_s29 }
   0x5   :  { %237 = vmatmul.msk.bf16.vlgmr.msra.gmra.mxu0 %vm77_vm0, %v245_v1  ;;  %239 = vmatmul.msk.bf16.vlgmr.msra.gmra.mxu1 %vm77_vm0, %v247_v2  ;;  %v250_v7 = vld [vmem:[%s389_s0 + $0x28] sm:$0xff]  ;;  %v252_v8 = vld [vmem:[%s389_s0 + $0x38] sm:$0xff]  ;;  %s333_s0 = smov [#allocation2]   ;;  %s335_s3 = smov 4  }
   0x6   :  { %241 = vmatmul.msk.bf16.vlgmr.msra.gmra.mxu2 %vm77_vm0, %v249_v3  ;;  %243 = vmatmul.msk.bf16.vlgmr.msra.gmra.mxu3 %vm77_vm0, %v251_v4  ;;  %s187_s26 = sshll.u32 %s333_s0, 4  ;;  %s188_s26 = int_to_ptr.vmem [resolvable:$true] %s187_s26 }
  0x15   :  { %238 = vmatmul.msk.bf16.gmra.mxu0 %vm77_vm0, %v246_v5  ;;  %240 = vmatmul.msk.bf16.gmra.mxu1 %vm77_vm0, %v248_v6 }
  0x16   :  { %242 = vmatmul.msk.bf16.gmra.mxu2 %vm77_vm0, %v250_v7  ;;  %244 = vmatmul.msk.bf16.gmra.mxu3 %vm77_vm0, %v252_v8 }
  0x82   :  { %v111_v9 = vpop.f32.mrf.mxu0  ;;  %v121_v10 = vpop.f32.mrf.mxu1 }
  0x89   :  { %v131_v11 = vpop.f32.mrf.mxu2  ;;  %v141_v12 = vpop.f32.mrf.mxu3 }
  0x8a   :  { %v113_v13 = vpop.f32.mrf.mxu0  ;;  %v123_v14 = vpop.f32.mrf.mxu1 }
  0x8b   :  { %v257_v15 = vpack.c.bf16 %v113_v13, %v111_v9  ;;  %v267_v16 = vpack.c.bf16 %v123_v14, %v121_v10 }
  0x8d   :  { %258 = vst [vmem:[#allocation2] sm:$0xff] %v257_v15  }
  0x8e   :  { %295 = vst [vmem:[#allocation2 + $0x10] sm:$0xff] %v267_v16  }
  0x91   :  { %v133_v17 = vpop.f32.mrf.mxu2  ;;  %v143_v18 = vpop.f32.mrf.mxu3 }
  0x92   :  { %v277_v19 = vpack.c.bf16 %v133_v17, %v131_v11  ;;  %v287_v20 = vpack.c.bf16 %v143_v18, %v141_v12  ;;  %v116_v21 = vpop.f32.mrf.mxu0  ;;  %v126_v22 = vpop.f32.mrf.mxu1 }
  0x94   :  { %297 = vst [vmem:[#allocation2 + $0x20] sm:$0xff] %v277_v19  }
  0x95   :  { %299 = vst [vmem:[#allocation2 + $0x30] sm:$0xff] %v287_v20  }
  0x99   :  { %v136_v23 = vpop.f32.mrf.mxu2  ;;  %v146_v24 = vpop.f32.mrf.mxu3 }
  0x9a   :  { %v118_v25 = vpop.f32.mrf.mxu0  ;;  %v128_v26 = vpop.f32.mrf.mxu1 }
  0x9b   :  { %v262_v27 = vpack.c.bf16 %v118_v25, %v116_v21  ;;  %v272_v28 = vpack.c.bf16 %v128_v26, %v126_v22 }
  0x9d   :  { %294 = vst [vmem:[#allocation2 + $0x8] sm:$0xff] %v262_v27  }
  0x9e   :  { %296 = vst [vmem:[#allocation2 + $0x18] sm:$0xff] %v272_v28  }
  0xa1   :  { %v138_v29 = vpop.f32.mrf.mxu2  ;;  %v148_v30 = vpop.f32.mrf.mxu3 }
  0xa2   :  { %v282_v31 = vpack.c.bf16 %v138_v29, %v136_v23  ;;  %v292_v32 = vpack.c.bf16 %v148_v30, %v146_v24 }
  0xa4   :  { %298 = vst [vmem:[#allocation2 + $0x28] sm:$0xff] %v282_v31  }
  0xa5   :  { %300 = vst [vmem:[#allocation2 + $0x38] sm:$0xff] %v292_v32  }
  0xa6   :  { %195 = dma.vmem_to_hbm [thread:$0]  %s188_s26, 1024, %s190_s29, [#allocation3], %s334_s30, %s334_s30, %s335_s3  }
  0xa7   :  { %331 = dma.done.wait [#allocation3], 1024  }
  0xa8   :  { %332 = vsyncadd [#allocation3], 4294966272 }
  0xa9   :  { %200 = vsyncpa [#allocation3], 1 }

</bundles_post_ra>
